<compile_context>
chip_gen: v7x
topology: tpu7x:2x2x1
jax: 0.10.0
libtpu: 0.0.40
codegen_flags: <defaults>
</compile_context>

<pallas_src>
import math

import jax
import jax.numpy as jnp
from jax.experimental import pallas as pl
from jax.experimental.pallas import tpu as pltpu


def _default_vmem_limit():
    """~48 MiB on v7x (64 MiB phys), ~96 MiB on v5e/v6e (128 MiB phys)."""
    try:
        cap = pltpu.get_tpu_info().vmem_capacity_bytes
        return min(96 * 1024 * 1024, (cap * 3) // 4)
    except Exception:
        return 32 * 1024 * 1024  # conservative scoped default, safe everywhere


_VMEM_LIMIT = _default_vmem_limit()


def _pick_tile(dim: int, cap: int, multiple: int) -> int:
    """Largest tile <= cap that divides dim and is a multiple of `multiple`.

    Falls back to the full dim (always layout-legal).
    TODO(synk): a padded/masked last tile would avoid the full-dim fallback for awkward dims.
    """
    if dim <= cap:
        return dim
    for t in range(cap - cap % multiple, 0, -multiple):
        if dim % t == 0:
            return t
    return dim


def _head_group(n_head: int, hd: int) -> int:
    """Smallest group of heads whose packed width G*hd is a multiple of 128 lanes."""
    for g in range(1, n_head + 1):
        if n_head % g == 0 and (g * hd) % 128 == 0:
            return g
    return n_head


# ----------------------------------------------------------------------------
# Linear kernels: bf16 operands, f32 VMEM accumulator, bias added at the end.
# ----------------------------------------------------------------------------
def _make_linear_kernel(red_axis):
    def kernel(x_ref, w_ref, b_ref, o_ref, acc_ref):
        kk = pl.program_id(red_axis)

        @pl.when(kk == 0)
        def _():
            acc_ref[...] = jnp.zeros_like(acc_ref)

        acc_ref[...] += jnp.dot(
            x_ref[...].astype(jnp.bfloat16),
            w_ref[...].astype(jnp.bfloat16),
            preferred_element_type=jnp.float32,
        )

        @pl.when(kk == pl.num_programs(red_axis) - 1)
        def _():
            o_ref[...] = (acc_ref[...] + b_ref[...].astype(jnp.float32)).astype(o_ref.dtype)

    return kernel


def _qkv_linear(x2d, w_qkv, b_qkv, *, tm_cap=512, tn_cap=512, tk_cap=512):
    """x2d: (M, C) ; w_qkv: (3, C, C) bf16 ; b_qkv: (3, 1, C) -> (3, M, C)."""
    M, K = x2d.shape
    _, _, N = w_qkv.shape
    tm = _pick_tile(M, tm_cap, 8)
    tn = _pick_tile(N, tn_cap, 128)
    tk = _pick_tile(K, tk_cap, 128)

    return pl.pallas_call(
        _make_linear_kernel(red_axis=3),
        out_shape=jax.ShapeDtypeStruct((3, M, N), x2d.dtype),
        grid=(3, M // tm, N // tn, K // tk),
        in_specs=[
            pl.BlockSpec((tm, tk), lambda p, i, j, kk: (i, kk)),
            pl.BlockSpec((None, tk, tn), lambda p, i, j, kk: (p, kk, j)),
            pl.BlockSpec((None, 1, tn), lambda p, i, j, kk: (p, 0, j)),
        ],
        out_specs=pl.BlockSpec((None, tm, tn), lambda p, i, j, kk: (p, i, j)),
        scratch_shapes=[pltpu.VMEM((tm, tn), jnp.float32)],
        compiler_params=pltpu.CompilerParams(
            dimension_semantics=("parallel", "parallel", "parallel", "arbitrary"),
            vmem_limit_bytes=_VMEM_LIMIT),
    )(x2d, w_qkv, b_qkv)


def _linear(x2d, w, b2d, *, tm_cap=512, tn_cap=512, tk_cap=512):
    """x2d: (M, K) ; w: (K, N) bf16 ; b2d: (1, N) -> (M, N)."""
    M, K = x2d.shape
    _, N = w.shape
    tm = _pick_tile(M, tm_cap, 8)
    tn = _pick_tile(N, tn_cap, 128)
    tk = _pick_tile(K, tk_cap, 128)

    # TODO(synk): consider pipeline_mode=pl.Buffered(3) on the K-axis specs if profiling
    # shows exposed DMA on large K (keep 2 on v7x if VMEM is tight).
    return pl.pallas_call(
        _make_linear_kernel(red_axis=2),
        out_shape=jax.ShapeDtypeStruct((M, N), x2d.dtype),
        grid=(M // tm, N // tn, K // tk),
        in_specs=[
            pl.BlockSpec((tm, tk), lambda i, j, kk: (i, kk)),
            pl.BlockSpec((tk, tn), lambda i, j, kk: (kk, j)),
            pl.BlockSpec((1, tn), lambda i, j, kk: (0, j)),
        ],
        out_specs=pl.BlockSpec((tm, tn), lambda i, j, kk: (i, j)),
        scratch_shapes=[pltpu.VMEM((tm, tn), jnp.float32)],
        compiler_params=pltpu.CompilerParams(
            dimension_semantics=("parallel", "parallel", "arbitrary"),
            vmem_limit_bytes=_VMEM_LIMIT),
    )(x2d, w, b2d)


# ----------------------------------------------------------------------------
# Flash-style attention over head groups.
#   qkv : (3, B, T, C)   (q / k / v selected via the leading-axis block index)
#   out : (B, T, C)      (heads merged along the lane axis -> free reshape for proj)
# ----------------------------------------------------------------------------
def _attention(qkv, n_head, attn_mask, valid_mask, mask_value):
    _, B, T, C = qkv.shape
    H = n_head
    hd = C // H
    scale = 1.0 / math.sqrt(hd)
    G = _head_group(H, hd)          # heads per grid step (packed along lanes)
    gw = G * hd                     # packed channel width per step
    HG = H // G

    has_am = attn_mask is not None
    has_vm = valid_mask is not None

    tq = _pick_tile(T, 256, 32 if has_am else 8)   # int8 mask: keep sublanes 32-aligned
    tkv = _pick_tile(T, 512, 128)
    nq, nkv = T // tq, T // tkv

    def kernel(*refs):
        refs = list(refs)
        q_ref, k_ref, v_ref = refs[:3]
        refs = refs[3:]
        am_ref = refs.pop(0) if has_am else None
        vm_ref = refs.pop(0) if has_vm else None
        o_ref, m_ref, l_ref, acc_ref = refs

        kv_i = pl.program_id(3)

        @pl.when(kv_i == 0)
        def _():
            m_ref[...] = jnp.full_like(m_ref, -jnp.inf)
            l_ref[...] = jnp.zeros_like(l_ref)
            acc_ref[...] = jnp.zeros_like(acc_ref)

        # (tq, gw) / (tkv, gw) -> (G, tq/tkv, hd); scale folded into q before the matmul.
        q3 = jnp.transpose((q_ref[...] * scale).reshape(tq, G, hd), (1, 0, 2)).astype(jnp.bfloat16)
        k3 = jnp.transpose(k_ref[...].reshape(tkv, G, hd), (1, 0, 2)).astype(jnp.bfloat16)
        v3 = jnp.transpose(v_ref[...].reshape(tkv, G, hd), (1, 0, 2)).astype(jnp.bfloat16)

        s = jnp.einsum("gqd,gkd->gqk", q3, k3,
                       preferred_element_type=jnp.float32)          # (G, tq, tkv) f32

        if has_am:
            s = jnp.where(am_ref[...][None, :, :] == 0, mask_value, s)
        if has_vm:
            s = jnp.where(vm_ref[...][None, :, :] == 0, mask_value, s)

        m_prev = m_ref[...]                                          # (G, tq, 1)
        m_new = jnp.maximum(m_prev, jnp.max(s, axis=-1, keepdims=True))
        alpha = jnp.exp(m_prev - m_new)
        p = jnp.exp(s - m_new)                                       # (G, tq, tkv)
        l_ref[...] = alpha * l_ref[...] + jnp.sum(p, axis=-1, keepdims=True)
        acc_ref[...] = alpha * acc_ref[...] + jnp.einsum(
            "gqk,gkd->gqd", p.astype(jnp.bfloat16), v3,
            preferred_element_type=jnp.float32)                      # (G, tq, hd)
        m_ref[...] = m_new
        # TODO(synk): attn_pdrop dropout would be applied to p here in train mode.

        @pl.when(kv_i == pl.num_programs(3) - 1)
        def _():
            inv_l = pl.reciprocal(l_ref[...], approx=True)           # (G, tq, 1) via EUP
            out = acc_ref[...] * inv_l                               # (G, tq, hd)
            out = jnp.transpose(out, (1, 0, 2)).reshape(tq, gw)      # lane-dense store
            o_ref[...] = out.astype(o_ref.dtype)

    in_specs = [
        pl.BlockSpec((None, None, tq, gw), lambda b, g, iq, ik: (0, b, iq, g)),
        pl.BlockSpec((None, None, tkv, gw), lambda b, g, iq, ik: (1, b, ik, g)),
        pl.BlockSpec((None, None, tkv, gw), lambda b, g, iq, ik: (2, b, ik, g)),
    ]
    inputs = [qkv, qkv, qkv]
    if has_am:
        in_specs.append(pl.BlockSpec((None, tq, tkv), lambda b, g, iq, ik: (b, iq, ik)))
        inputs.append((attn_mask != 0).astype(jnp.int8))
    if has_vm:
        in_specs.append(pl.BlockSpec((None, 1, tkv), lambda b, g, iq, ik: (b, 0, ik)))
        inputs.append((valid_mask != 0).astype(jnp.int8).reshape(B, 1, T))

    return pl.pallas_call(
        kernel,
        out_shape=jax.ShapeDtypeStruct((B, T, C), qkv.dtype),
        grid=(B, HG, nq, nkv),
        in_specs=in_specs,
        out_specs=pl.BlockSpec((None, tq, gw), lambda b, g, iq, ik: (b, iq, g)),
        scratch_shapes=[
            pltpu.VMEM((G, tq, 1), jnp.float32),    # running max
            pltpu.VMEM((G, tq, 1), jnp.float32),    # running sum
            pltpu.VMEM((G, tq, hd), jnp.float32),   # output accumulator
        ],
        compiler_params=pltpu.CompilerParams(
            dimension_semantics=("parallel", "parallel", "parallel", "arbitrary"),
            vmem_limit_bytes=_VMEM_LIMIT),
    )(*inputs)


# ----------------------------------------------------------------------------
# Parameter prep (hoisted out of the forward): fuse q/k/v weights, cast to bf16.
# Weights use JAX orientation W[in, out]; transpose PyTorch nn.Linear weights to load.
# ----------------------------------------------------------------------------
def prepare_params(params, compute_dtype=jnp.bfloat16):
    C = params["wq"].shape[0]
    return {
        "w_qkv": jnp.stack([params["wq"], params["wk"], params["wv"]], axis=0).astype(compute_dtype),
        "b_qkv": jnp.stack([params["bq"], params["bk"], params["bv"]], axis=0)
                    .reshape(3, 1, C).astype(jnp.float32),
        "w_proj": params["w_proj"].astype(compute_dtype),
        "b_proj": params["b_proj"].reshape(1, C).astype(jnp.float32),
    }


def causal_self_attention_forward(x, prepared, n_head, attn_mask=None,
                                  valid_input_mask=None, mask_value=-1000000.0):
    B, T, C = x.shape
    assert C % n_head == 0

    qkv = _qkv_linear(x.reshape(B * T, C), prepared["w_qkv"], prepared["b_qkv"])  # (3, B*T, C)
    qkv = qkv.reshape(3, B, T, C)                                                 # free reshape

    y = _attention(qkv, n_head, attn_mask, valid_input_mask, mask_value)          # (B, T, C)

    out = _linear(y.reshape(B * T, C), prepared["w_proj"], prepared["b_proj"])    # (B*T, C)
    # TODO(synk): resid_pdrop dropout omitted (eval-mode identity).
    return out.reshape(B, T, C)


# ----------------------------------------------------------------------------
# Pure-JAX reference (mirrors the PyTorch forward, eval mode, f32 everywhere).
# ----------------------------------------------------------------------------
def reference_forward(x, params, n_head, attn_mask, valid_input_mask,
                      mask_value=-1000000.0):
    B, T, C = x.shape
    hd = C // n_head
    q = x @ params["wq"] + params["bq"]
    k = x @ params["wk"] + params["bk"]
    v = x @ params["wv"] + params["bv"]

    def heads(t):
        return t.reshape(B, T, n_head, hd).transpose(0, 2, 1, 3)

    q, k, v = heads(q), heads(k), heads(v)
    att = jnp.einsum("bhtd,bhsd->bhts", q, k) * (1.0 / math.sqrt(hd))
    if attn_mask is not None:
        att = jnp.where(attn_mask[:, None, :, :] == 0, mask_value, att)
    if valid_input_mask is not None:
        att = jnp.where(valid_input_mask[:, None, None, :] == 0, mask_value, att)
    att = jax.nn.softmax(att, axis=-1)
    y = jnp.einsum("bhts,bhsd->bhtd", att, v)
    y = y.transpose(0, 2, 1, 3).reshape(B, T, C)
    return y @ params["w_proj"] + params["b_proj"]


if __name__ == "__main__":
    B, T, C, H = 2, 8, 32, 4  # batch, seq, n_embd, n_head

    key = jax.random.PRNGKey(0)
    ks = jax.random.split(key, 9)
    x = jax.random.normal(ks[0], (B, T, C), dtype=jnp.float32)
    params = {
        "wq": 0.1 * jax.random.normal(ks[1], (C, C), jnp.float32),
        "bq": 0.1 * jax.random.normal(ks[2], (C,), jnp.float32),
        "wk": 0.1 * jax.random.normal(ks[3], (C, C), jnp.float32),
        "bk": 0.1 * jax.random.normal(ks[4], (C,), jnp.float32),
        "wv": 0.1 * jax.random.normal(ks[5], (C, C), jnp.float32),
        "bv": 0.1 * jax.random.normal(ks[6], (C,), jnp.float32),
        "w_proj": 0.1 * jax.random.normal(ks[7], (C, C), jnp.float32),
        "b_proj": 0.1 * jax.random.normal(ks[8], (C,), jnp.float32),
    }
    prepared = prepare_params(params)

    # Causal attention mask (B, T, T) and a valid-input mask (B, T) with the
    # last two key positions of batch 1 marked invalid.
    attn_mask = jnp.broadcast_to(jnp.tril(jnp.ones((T, T), jnp.float32)), (B, T, T))
    valid_input_mask = jnp.ones((B, T), jnp.float32).at[1, -2:].set(0.0)

    out = causal_self_attention_forward(
        x, prepared, H, attn_mask=attn_mask, valid_input_mask=valid_input_mask)
    out = jax.block_until_ready(out)

    ref = reference_forward(x, params, H, attn_mask, valid_input_mask)
    assert out.shape == (B, T, C)
    err = float(jnp.max(jnp.abs(out - ref)))
    # bf16 MXU operands -> allow bf16-level tolerance against the f32 reference.
    assert jnp.allclose(out, ref, atol=2e-2, rtol=2e-2), f"mismatch, max abs err={err}"

    print("KERNEL_OK")
</pallas_src>

<mosaic_0001>
module attributes {stable_mosaic.version = 11 : i64} {
  func.func @kernel(%arg0: i32, %arg1: i32, %arg2: i32, %arg3: i32, %arg4: memref<16x32xf32, #tpu.memory_space<vmem>>, %arg5: memref<1x32x32xbf16, #tpu.memory_space<vmem>>, %arg6: memref<1x1x32xf32, #tpu.memory_space<vmem>>, %arg7: memref<1x16x32xf32, #tpu.memory_space<vmem>>, %arg8: memref<16x32xf32, #tpu.memory_space<vmem>>) attributes {dimension_semantics = [#tpu.dimension_semantics<parallel>, #tpu.dimension_semantics<parallel>, #tpu.dimension_semantics<parallel>, #tpu.dimension_semantics<arbitrary>], iteration_bounds = array<i64: 3, 1, 1, 1>, scalar_prefetch = 0 : i64, scratch_operands = 1 : i64, tpu.core_type = #tpu.core_type<tc>, window_params = [{transform_indices = @transform_0, window_bounds = array<i64: 16, 32>}, {transform_indices = @transform_1, window_bounds = array<i64: 1, 32, 32>}, {transform_indices = @transform_2, window_bounds = array<i64: 1, 1, 32>}, {transform_indices = @transform_3, window_bounds = array<i64: 1, 16, 32>}]} {
    %c0_i32 = arith.constant 0 : i32
    %0 = arith.cmpi eq, %arg3, %c0_i32 : i32
    %1 = arith.extui %0 : i1 to i32
    %c0_i32_0 = arith.constant 0 : i32
    %2 = arith.cmpi ne, %1, %c0_i32_0 : i32
    scf.if %2 {
      %cst_11 = arith.constant 0.000000e+00 : f32
      %14 = vector.broadcast %cst_11 : f32 to vector<16x32xf32>
      %c0_12 = arith.constant 0 : index
      %c0_13 = arith.constant 0 : index
      %15 = vector.load %arg8[%c0_12, %c0_13] : memref<16x32xf32, #tpu.memory_space<vmem>>, vector<16x32xf32>
      tpu.vector_store %arg8[%c0_12, %c0_13], %14 {strides = array<i32>} : memref<16x32xf32, #tpu.memory_space<vmem>>, vector<16x32xf32>,
    } else {
    }
    %c0 = arith.constant 0 : index
    %c0_1 = arith.constant 0 : index
    %3 = vector.load %arg8[%c0, %c0_1] : memref<16x32xf32, #tpu.memory_space<vmem>>, vector<16x32xf32>
    %c0_2 = arith.constant 0 : index
    %c0_3 = arith.constant 0 : index
    %4 = vector.load %arg4[%c0_2, %c0_3] : memref<16x32xf32, #tpu.memory_space<vmem>>, vector<16x32xf32>
    %5 = arith.truncf %4 : vector<16x32xf32> to vector<16x32xbf16>
    %c0_4 = arith.constant 0 : index
    %c0_5 = arith.constant 0 : index
    %c0_6 = arith.constant 0 : index
    %6 = vector.load %arg5[%c0_4, %c0_5, %c0_6] : memref<1x32x32xbf16, #tpu.memory_space<vmem>>, vector<1x32x32xbf16>
    %7 = vector.shape_cast %6 : vector<1x32x32xbf16> to vector<32x32xbf16>
    %cst = arith.constant dense<0.000000e+00> : vector<16x32xf32>
    %8 = tpu.matmul %5, %7, %cst {dimension_numbers = #tpu.dot_dimension_numbers<[1], [0], [0], [1], [0, 0, 1, 1], [], []>} : vector<16x32xbf16>, vector<32x32xbf16>, vector<16x32xf32> -> vector<16x32xf32>
    %9 = arith.addf %3, %8 : vector<16x32xf32>
    %c0_7 = arith.constant 0 : index
    %c0_8 = arith.constant 0 : index
    %10 = vector.load %arg8[%c0_7, %c0_8] : memref<16x32xf32, #tpu.memory_space<vmem>>, vector<16x32xf32>
    tpu.vector_store %arg8[%c0_7, %c0_8], %9 {strides = array<i32>} : memref<16x32xf32, #tpu.memory_space<vmem>>, vector<16x32xf32>,
    %c0_i32_9 = arith.constant 0 : i32
    %11 = arith.cmpi eq, %arg3, %c0_i32_9 : i32
    %12 = arith.extui %11 : i1 to i32
    %c0_i32_10 = arith.constant 0 : i32
    %13 = arith.cmpi ne, %12, %c0_i32_10 : i32
    scf.if %13 {
      %c0_11 = arith.constant 0 : index
      %c0_12 = arith.constant 0 : index
      %14 = vector.load %arg8[%c0_11, %c0_12] : memref<16x32xf32, #tpu.memory_space<vmem>>, vector<16x32xf32>
      %c0_13 = arith.constant 0 : index
      %c0_14 = arith.constant 0 : index
      %c0_15 = arith.constant 0 : index
      %15 = vector.load %arg6[%c0_13, %c0_14, %c0_15] : memref<1x1x32xf32, #tpu.memory_space<vmem>>, vector<1x1x32xf32>
      %16 = vector.shape_cast %15 : vector<1x1x32xf32> to vector<1x32xf32>
      %17 = vector.broadcast %16 : vector<1x32xf32> to vector<16x32xf32>
      %18 = arith.addf %14, %17 : vector<16x32xf32>
      %c0_16 = arith.constant 0 : index
      %c0_17 = arith.constant 0 : index
      %c0_18 = arith.constant 0 : index
      %19 = vector.load %arg7[%c0_16, %c0_17, %c0_18] : memref<1x16x32xf32, #tpu.memory_space<vmem>>, vector<1x16x32xf32>
      %20 = vector.shape_cast %19 : vector<1x16x32xf32> to vector<16x32xf32>
      %21 = vector.shape_cast %18 : vector<16x32xf32> to vector<1x16x32xf32>
      tpu.vector_store %arg7[%c0_16, %c0_17, %c0_18], %21 {strides = array<i32>} : memref<1x16x32xf32, #tpu.memory_space<vmem>>, vector<1x16x32xf32>,
    } else {
    }
    return
  }
  func.func @transform_0(%arg0: i32, %arg1: i32, %arg2: i32, %arg3: i32) -> (i32, i32) {
    %c0_i32 = arith.constant 0 : i32
    return %arg1, %arg3 : i32, i32
  }
  func.func @transform_1(%arg0: i32, %arg1: i32, %arg2: i32, %arg3: i32) -> (i32, i32, i32) {
    %c0_i32 = arith.constant 0 : i32
    return %arg0, %arg3, %arg2 : i32, i32, i32
  }
  func.func @transform_2(%arg0: i32, %arg1: i32, %arg2: i32, %arg3: i32) -> (i32, i32, i32) {
    %c0_i32 = arith.constant 0 : i32
    %c0_i32_0 = arith.constant 0 : i32
    return %arg0, %c0_i32, %arg2 : i32, i32, i32
  }
  func.func @transform_3(%arg0: i32, %arg1: i32, %arg2: i32, %arg3: i32) -> (i32, i32, i32) {
    %c0_i32 = arith.constant 0 : i32
    return %arg0, %arg1, %arg2 : i32, i32, i32
  }
}

</mosaic_0001>

<bundles_post_ra>
// kernel: tpu_custom_call.1
= control target key start
LH: loop header
LB: loop body
LE: loop exit
PB: predicated region body
PF: predicated region fallthrough
CT: control target
= control target key end

     0   :  { %8 = vsyncpa [#allocation4], 0  ;;  %s1041_s0 = inlined_call_operand.hbm [shape: f32[16,32], index: 0, kind: input, shape index: {}]   ;;  %s1042_s1 = inlined_call_operand.hbm [shape: bf16[3,32,32], index: 1, kind: input, shape index: {}]   ;;  %s1043_s2 = inlined_call_operand.vmem [shape: f32[3,1,32], index: 2, kind: input, shape index: {}]   ;;  %s1044_s3 = inlined_call_operand.hbm [shape: f32[3,16,32], index: 3, kind: output, shape index: {}]  }
   0x1   :  { %9 = vsyncpa [#allocation7], 0 }
   0x2   :  { %11 = vsyncpa [#allocation7 + $0x1], 0 }
   0x3   :  { %12 = vsyncpa [#allocation5], 0 }
   0x4   :  { %14 = vsyncpa [#allocation5 + $0x1], 0  ;;  %s808_s12 = smov 0   ;;  %s810_s13 = smov 0  }
   0x5   :  { %s812_s14 = smov 0   ;;  %s814_s15 = smov 0  }
   0x6   :  { %s816_s16 = smov 0   ;;  %s818_s17 = smov 0  }
   0x7 LB: > { %s514_s18 = sadd.s32 4294967295, %s775_s17   ;;  %s515_s19 = sadd.s32 4294967294, %s775_s17   ;;  %s775_s17 = sphi %s818_s17, %s20_s17   ;;  %s771_s16 = sphi %s816_s16, %s1067_s16   ;;  %s767_s15 = sphi %s814_s15, %s1066_s15   ;;  %s763_s14 = sphi %s812_s14, %s1065_s14   ;;  %s759_s13 = sphi %s810_s13, %s1064_s13   ;;  %s755_s12 = sphi %s808_s12, %s1063_s12  }
   0x8   : > { %p98_p0 = scmp.ne.s32.totalorder %s759_s13, %s755_s12  ;;  %p842_p1 = scmp.eq.s32.totalorder %s514_s18, 0 }
   0x9   : > { %p846_p2 = scmp.eq.s32.totalorder %s514_s18, 2  ;;  %p160_p3 = scmp.eq.s32.totalorder %s515_s19, 2 }
   0xa   : > { %s1049_s20 = scalar_select %p842_p1, 1, 0 }
   0xb   : > { %s1050_s21 = scalar_select %p846_p2, 1, 0 }
   0xc   : > { %p852_p4 = por %p842_p1, %p98_p0  ;;  %p516_p5 = scmp.ge.s32.totalorder %s775_s17, 1 }
   0xd   : > { %p857_p6 = por %p160_p3, %p98_p0  ;;  %p167_p7 = scmp.lt.s32.totalorder %s775_s17, 4 }
   0xe   : > { %s1051_s22 = scalar_select %p852_p4, 1, 0 }
   0xf   : > { %s1052_s23 = scalar_select %p857_p6, 1, 0 }
  0x10   : > { %p862_p8 = pnand %p516_p5, %p167_p7  ;;  %s777_s25 = smov [#allocation3]  }
  0x11   : > { %s183_s26 = sshll.u32 %s777_s25, 4  ;;  %s46_s28 = sadd.s32 1, %s771_s16  ;;  %s184_s26 = int_to_ptr.vmem [resolvable:$true] %s183_s26 }
  0x12   : > { %s1053_s24 = scalar_select %p862_p8, 1, 0 }
  0x13   : > { %p556_p9 = pneg %p862_p8  ;;  %s631_s4 = scalar_lea.hbm %s1041_s0, 256 }
  0x14   : > { %p632_p11 = scmp.ne.s32.totalorder %s1041_s0, %s631_s4  ;;  %p638_p3 = scmp.lt.u32.totalorder %s631_s4, %s1041_s0 }
  0x15   : > { %p870_p10 = pnand %p556_p9, %p842_p1 }
  0x17   : > { %p633_p12 = pneg %p870_p10 }
  0x19   : > { %p634_p13 = pnand %p633_p12, %p632_p11 }
  0x1b   : > { %p635_p0 = pneg %p634_p13 }
  0x1d   : > { %p640_p5 = pnand %p638_p3, %p635_p0 }
  0x1f   : > { %643 = shalt.err (!%p640_p5)
}
  0x20   : > { %s644_s9 = scalar_lea.vmem %s184_s26, 256  ;;  %p652_p4 = scmp.lt.s32.totalorder %s184_s26, %s184_s26 }
  0x21   : > { %p645_p7 = scmp.ne.s32.totalorder %s184_s26, %s644_s9  ;;  %p653_p1 = scmp.lt.s32.totalorder %s644_s9, %s644_s9 }
  0x23   : > { %p647_p9 = pnand %p645_p7, %p633_p12  ;;  %p654_p8 = por %p653_p1, %p652_p4 }
  0x25   : > { %p648_p6 = pneg %p647_p9 }
  0x27   : > { %p655_p2 = pnand %p654_p8, %p648_p6 }
  0x29   : > { %658 = shalt.err (!%p655_p2)
}
  0x2a   : > { %s778_s10 = smov 128   ;;  %s779_s11 = smov 8  }
  0x2b   : > { %559 = dma.hbm_to_vmem [thread:$0]  (!%p870_p10), %s1041_s0, 256, %s184_s26, [#allocation4], %s778_s10, %s778_s10, %s779_s11  }
  0x2c   : > { %p48_p1 = scmp.ge.s32.totalorder %s46_s28, 3  ;;  %s85_s25 = sadd.s32 1, %s763_s14 }
  0x2d   : > { %p92_p2 = scmp.ne.s32.totalorder %s763_s14, %s759_s13  ;;  %p93_p4 = scmp.eq.s32.totalorder %s775_s17, 0 }
  0x2e   : > { %s1069_s28 = smov (%p48_p1, %s46_s28), 0  ;;  %p1056_p8 = scmp.ne.s32.totalorder %s1050_s21, 0 }
  0x2f   : > { %p897_p6 = por %p93_p4, %p92_p2  ;;  %s78_s27 = ssub.s32 %s771_s16, %s1069_s28 }
  0x30   : > { %p903_p11 = por %p1056_p8, %p92_p2  ;;  %p569_p12 = scmp.lt.s32.totalorder %s775_s17, 3 }
  0x31   : > { %p83_p10 = scmp.eq.s32.totalorder %s78_s27, 0  ;;  %s197_s26 = sand.u32 1, %s763_s14  }
  0x32   : > { %s519_s4 = sshll.u32 %s197_s26, 4  ;;  %s535_s6 = sshll.u32 %s771_s16, 8 }
  0x33   : > { %s912_s5 = scalar_select %p83_p10, %s763_s14, %s85_s25  }
  0x34   : > { %s918_s9 = scalar_lea.hbm %s1042_s1, %s535_s6  ;;  %s201_s21 = scalar_lea.vmem [#allocation6], %s519_s4 }
  0x35   : > { %s211_s10 = sshll.u32 %s201_s21, 4  ;;  %p924_p13 = pnand %p569_p12, %p897_p6  ;;  %s920_s10 = int_to_ptr.vmem [resolvable:$true] %s211_s10 }
  0x36   : > { %s928_s18 = scalar_lea.sflag [#allocation7], %s197_s26  ;;  %s659_s19 = scalar_lea.hbm %s918_s9, 256 }
  0x37   : > { %p660_p0 = scmp.ne.s32.totalorder %s918_s9, %s659_s19  ;;  %p661_p3 = pneg %p924_p13 }
  0x38   : > { %s664_s29 = scalar_lea.hbm %s1042_s1, 768  ;;  %p665_p9 = scmp.lt.u32.totalorder %s918_s9, %s1042_s1 }
  0x39   : > { %p662_p5 = pnand %p661_p3, %p660_p0  ;;  %p666_p1 = scmp.lt.u32.totalorder %s664_s29, %s659_s19 }
  0x3a   : > { %p668_p4 = scmp.lt.u32.totalorder %s659_s19, %s918_s9 }
  0x3b   : > { %p663_p7 = pneg %p662_p5  ;;  %p667_p2 = por %p666_p1, %p665_p9 }
  0x3d   : > { %p669_p6 = por %p668_p4, %p667_p2 }
  0x3f   : > { %p670_p8 = pnand %p669_p6, %p663_p7 }
  0x41   : > { %673 = shalt.err (!%p670_p8)
}
  0x42   : > { %s674_s26 = scalar_lea.vmem %s920_s10, 256  ;;  %s780_s7 = smov [#allocation6]  }
  0x43   : > { %p675_p12 = scmp.ne.s32.totalorder %s920_s10, %s674_s26  ;;  %s679_s8 = sshll.u32 %s780_s7, 4  ;;  %s680_s8 = int_to_ptr.vmem [resolvable:$false] %s679_s8 }
  0x44   : > { %s681_s21 = scalar_lea.vmem %s680_s8, 512  ;;  %p682_p5 = scmp.lt.s32.totalorder %s920_s10, %s680_s8 }
  0x45   : > { %p677_p10 = pnand %p675_p12, %p661_p3  ;;  %p683_p9 = scmp.lt.s32.totalorder %s681_s21, %s674_s26 }
  0x47   : > { %p678_p0 = pneg %p677_p10  ;;  %p684_p1 = por %p683_p9, %p682_p5 }
  0x49   : > { %p685_p2 = pnand %p684_p1, %p678_p0 }
  0x4b   : > { %688 = shalt.err (!%p685_p2)
}
  0x4c   : > { %s781_s19 = smov 64   ;;  %s782_s25 = smov 4  }
  0x4d   : > { %563 = dma.hbm_to_vmem [thread:$0]  (!%p924_p13), %s918_s9, 256, %s920_s10, %s928_s18, %s781_s19, %s781_s19, %s782_s25  }
  0x4e   : > { %p1059_p3 = scmp.ne.s32.totalorder %s1053_s24, 0 }
  0x4f   : > { %p1060_p7 = scmp.ne.s32.totalorder (!%p1059_p3), %s1049_s20, 0 }
  0x50   : > { %232 = sbr.rel (%p1059_p3) target bundleno = 342 (0x156), region = 32 }
  0x57   : > { %742 = dma.done.wait (%p1060_p7), [#allocation4], 256  }
  0x58   : > { %744 = vsyncadd (%p1060_p7), [#allocation4], 4294967040  ;;  %s963_s27 = sand.u32 1, %s759_s13   ;;  %p1061_p13 = scmp.ne.s32.totalorder %s1051_s22, 0 }
  0x59   : > { %s524_s29 = sshll.u32 %s963_s27, 4  ;;  %s239_s4 = scalar_lea.sflag [#allocation7], %s963_s27 }
  0x5a   : > { %s242_s9 = scalar_lea.vmem [#allocation6], %s524_s29 }
  0x5b   : > { %746 = dma.done.wait (%p1061_p13), %s239_s4, 256  }
  0x5c   : > { %748 = vsyncadd (%p1061_p13), %s239_s4, 4294967040  ;;  %vm285_vm0 = vcmask 261120   ;;  %v783_v0 = vmov 0.0   ;;  %vm784_vm1 = vmmov 0   ;;  %v629_v1 = vld [vmem:[%s242_s9] sm:$0xff]   ;;  %v630_v2 = vld [vmem:[%s242_s9 + $0x8] sm:$0xff]  }
  0x5d   : > { %540 = vmatprep.subr.bf16.mxu0 %v783_v0  ;;  %544 = vmatprep.mubr.msk.bf16.mxu0 %vm784_vm1, %v783_v0  ;;  %286 = vst.msk [vmem:[#allocation2] sm:$0xff] %vm285_vm0, %v783_v0  ;;  %287 = vst.msk [vmem:[#allocation2 + $0x8] sm:$0xff] %vm285_vm0, %v783_v0  ;;  %v290_v3 = vld [vmem:[#allocation3] sm:$0xff]  ;;  %v291_v4 = vld [vmem:[#allocation3 + $0x8] sm:$0xff]  ;;  %p273_p4 = scmp.lt.s32.totalorder %s767_s15, 2  ;;  %s536_s11 = sshll.u32 %s767_s15, 8 }
  0x5e   : > { %541 = vmatpush3.bf16.msra.mxu0 %v629_v1  ;;  %v292_v5 = vpack.c.bf16 %v291_v4, %v290_v3  ;;  %s270_s18 = scalar_lea.vmem [#allocation8], %s524_s29  ;;  %s989_s8 = scalar_lea.hbm %s1044_s3, %s536_s11 }
  0x5f   : > { %542 = vmatprep.subr.bf16.mxu0 %v783_v0  ;;  %s274_s20 = scalar_select %p273_p4, %s767_s15, 2 }
  0x60   : > { %s391_s6 = sshll.u32 %s270_s18, 4  ;;  %s375_s15 = scalar_lea.sflag [#allocation5], %s963_s27  ;;  %s991_s6 = int_to_ptr.vmem [resolvable:$true] %s391_s6 }
  0x61   : > { %s278_s10 = scalar_lea.vmem %s1043_s2, %s274_s20  ;;  %s689_s21 = scalar_lea.vmem %s991_s6, 256 }
  0x62   : > { %543 = vmatpush3.bf16.msra.mxu0 %v630_v2  ;;  %v529_v14 = vld [vmem:[%s278_s10] ss:$0 sm:$0xff]  ;;  %p690_p6 = scmp.ne.s32.totalorder %s991_s6, %s689_s21  ;;  %s785_s19 = smov [#allocation8]  }
  0x63   : > { %s693_s25 = sshll.u32 %s785_s19, 4  ;;  %s694_s25 = int_to_ptr.vmem [resolvable:$false] %s693_s25 }
  0x64   : > { %v288_v6 = vld [vmem:[#allocation2] sm:$0xff]  ;;  %v289_v8 = vld [vmem:[#allocation2 + $0x8] sm:$0xff]  ;;  %p691_p8 = pnand %p690_p6, %p903_p11  ;;  %s695_s29 = scalar_lea.vmem %s694_s25, 512 }
  0x65   : > { %545 = vmatmul.mubr.msk.bf16.vlgmr.msra.gmra.mrb[0].mxu0 %vm285_vm0, %v292_v5  ;;  %p696_p10 = scmp.lt.s32.totalorder %s991_s6, %s694_s25  ;;  %p697_p0 = scmp.lt.s32.totalorder %s695_s29, %s689_s21 }
  0x66   : > { %p692_p12 = pneg %p691_p8 }
  0x67   : > { %p698_p5 = por %p697_p0, %p696_p10 }
  0x69   : > { %p699_p9 = pnand %p698_p5, %p692_p12 }
 0x138   : > { %v347_v7 = vpop.f32.mrb[0].mxu0 }
 0x139   : > { %v354_v9 = vadd.f32 %v347_v7, %v288_v6  ;;  %v546_v10 = vpop.f32.mrb[1].mxu0 }
 0x13a   : > { %v350_v11 = vpop.f32.mrb[2].mxu0 }
 0x13b   : > { %356 = vst.msk [vmem:[#allocation2] sm:$0xff] %vm285_vm0, %v354_v9  ;;  %v355_v12 = vadd.f32 %v350_v11, %v289_v8  ;;  %v547_v13 = vpop.f32.mrb[3].mxu0 }
 0x13d   : > { %357 = vst.msk [vmem:[#allocation2 + $0x8] sm:$0xff] %vm285_vm0, %v355_v12 }
 0x142   : > { %v361_v15 = vld [vmem:[#allocation2] sm:$0xff] }
 0x143   : > { %v370_v16 = vadd.f32 %v529_v14, %v361_v15 }
 0x144   : > { %v362_v17 = vld [vmem:[#allocation2 + $0x8] sm:$0xff] }
 0x145   : > { %v371_v18 = vadd.f32 %v529_v14, %v362_v17  ;;  %372 = vst.msk [vmem:[%s270_s18] sm:$0xff] %vm285_vm0, %v370_v16 }
 0x147   : > { %373 = vst.msk [vmem:[%s270_s18 + $0x8] sm:$0xff] %vm285_vm0, %v371_v18 }
 0x148   : > { %702 = shalt.err (!%p699_p9)
}
 0x149   : > { %s703_s4 = scalar_lea.hbm %s989_s8, 256  ;;  %s707_s22 = scalar_lea.hbm %s1044_s3, 768 }
 0x14a   : > { %p704_p1 = scmp.ne.s32.totalorder %s989_s8, %s703_s4  ;;  %p708_p7 = scmp.lt.u32.totalorder %s989_s8, %s1044_s3 }
 0x14b   : > { %p709_p13 = scmp.lt.u32.totalorder %s707_s22, %s703_s4  ;;  %p711_p6 = scmp.lt.u32.totalorder %s703_s4, %s989_s8 }
 0x14c   : > { %p705_p2 = pnand %p704_p1, %p903_p11 }
 0x14d   : > { %p710_p4 = por %p709_p13, %p708_p7 }
 0x14e   : > { %p706_p3 = pneg %p705_p2 }
 0x14f   : > { %p712_p8 = por %p711_p6, %p710_p4 }
 0x151   : > { %p713_p12 = pnand %p712_p8, %p706_p3 }
 0x153   : > { %716 = shalt.err (!%p713_p12)
}
 0x154   : > { %s786_s11 = smov 128   ;;  %s787_s18 = smov 8  }
 0x155   : > { %554 = dma.vmem_to_hbm [thread:$0]  (%p903_p11), %s991_s6, 256, %s989_s8, %s375_s15, %s786_s11, %s786_s11, %s787_s18  }
 0x156 PF: > { %p571_p10 = scmp.ge.s32.totalorder %s775_s17, 2  ;;  %s406_s26 = sand.u32 1, %s755_s12  }
 0x157   : > { %p1062_p0 = scmp.ne.s32.totalorder %s1052_s23, 0  ;;  %s407_s7 = scalar_lea.sflag [#allocation5], %s406_s26 }
 0x159   : > { %p565_p5 = pnand %p571_p10, %p1062_p0 }
 0x15b   : > { %750 = dma.done.wait (!%p565_p5), %s407_s7, 256  }
 0x15c   : > { %752 = vsyncadd (!%p565_p5), %s407_s7, 4294967040  ;;  %s20_s17 = sadd.s32 1, %s775_s17   ;;  %s1063_s12 = smov %s759_s13 }
 0x15d   : > { %p17_p9 = scmp.ge.s32.totalorder %s20_s17, 5   ;;  %s1064_s13 = smov %s763_s14 }
 0x15e   : > { %s1065_s14 = smov %s912_s5  ;;  %s1066_s15 = smov %s771_s16 }
 0x15f   : > { %s1067_s16 = smov %s1069_s28  ;;  %19 = sbr.rel (!%p17_p9) target bundleno = 7 (0x7), region = 94 }
 0x166   :  { %412 = vsyncpa [#allocation4], 1 }
 0x167   :  { %414 = vsyncpa [#allocation4 + $0x1], 1 }
 0x168   :  { %415 = vsyncpa [#allocation7], 1 }
 0x169   :  { %417 = vsyncpa [#allocation7 + $0x1], 1 }
 0x16a   :  { %418 = vsyncpa [#allocation5], 1 }
 0x16b   :  { %420 = vsyncpa [#allocation5 + $0x1], 1 }

</bundles_post_ra>
